<compile_context>
chip_gen: v7x
topology: tpu7x:2x2x1
jax: 0.10.0
libtpu: 0.0.40
codegen_flags: <defaults>
</compile_context>

<pallas_src>
import jax
import jax.numpy as jnp
from jax.experimental import pallas as pl
from jax.experimental.pallas import tpu as pltpu


def _round_up(v, m):
    return (v + m - 1) // m * m


def _pick_imgs_per_block(B, NP_pad, target_rows):
    """Largest divisor of B with imgs_per_block*NP_pad <= target_rows,
    while keeping >= 2 grid blocks whenever B >= 2 (megacore balance)."""
    cap = max(1, target_rows // NP_pad)
    best = 1
    for d in range(1, B + 1):
        if B % d == 0 and d <= cap:
            best = d
    if B // best < 2:                       # keep the grid non-degenerate
        for d in range(best, 0, -1):
            if B % d == 0 and B // d >= 2:
                best = d
                break
    return best


def _vmem_limit_bytes(tm, K_pad, H_pad, compute_dtype, out_dtype):
    cs = jnp.dtype(compute_dtype).itemsize
    osz = jnp.dtype(out_dtype).itemsize
    need = (tm * K_pad * cs * 2          # streamed patches (double buffered)
            + H_pad * K_pad * cs * 2     # resident weight (pallas allocs 2 bufs)
            + tm * H_pad * 4 * 2         # resident pos+bias (f32)
            + tm * H_pad * osz * 2       # streamed output
            + tm * H_pad * 4)            # f32 accumulator headroom
    limit = int(need * 1.5) + (4 << 20)
    return max(16 << 20, min(limit, 64 << 20))   # <= v7x physical VMEM


def _embed_kernel(p_ref, w_ref, pb_ref, out_ref):
    # p_ref:  (tm, Kp)   patch rows (flattened batch*patch axis)
    # w_ref:  (Hp, Kp)   full conv weight, hidden-major (VMEM-resident)
    # pb_ref: (tm, Hp)   position embeddings + conv bias, f32 (VMEM-resident)
    # out_ref:(tm, Hp)
    acc = jax.lax.dot_general(                       # MXU: patches @ W.T, f32 acc
        p_ref[...], w_ref[...],
        dimension_numbers=(((1,), (1,)), ((), ())),
        preferred_element_type=jnp.float32)
    out_ref[...] = (acc + pb_ref[...]).astype(out_ref.dtype)


def embeddings_forward(x, conv_w, conv_b, pos_emb, patch_size, *,
                       compute_dtype=jnp.bfloat16, target_rows=1024):
    """x: (B, C, H, W) NCHW. conv_w: (hidden, C, P, P). conv_b: (hidden,).
    pos_emb: (1, n_patches, hidden). Returns (embeddings, features=None)."""
    B, C, H, W = x.shape
    P = patch_size
    hidden = conv_w.shape[0]
    gh, gw = H // P, W // P
    n_patches = gh * gw
    K = C * P * P
    out_dtype = x.dtype

    # ---- padded / tiled problem sizes (lane-dense, MXU-aligned) ------------
    K_pad = _round_up(K, 128)                 # full contraction per step
    H_pad = _round_up(hidden, 128)            # whole hidden dim per step (weight resident)
    NP_pad = _round_up(n_patches, 8)          # sublane-aligned rows per image
    ipb = _pick_imgs_per_block(B, NP_pad, target_rows)
    tm = ipb * NP_pad                         # rows per grid step (>= 1 image)
    n_blocks = B // ipb
    rows = B * NP_pad

    # ---- glue (XLA; patches operand is a candidate for input fusion) -------
    # Cast FIRST so any un-fused relayout copy moves compute_dtype bytes.
    # NCHW -> (B, n_patches, K) with per-patch element order (c, ph, pw),
    # matching the PyTorch Conv2d weight layout (hidden, C, P, P).
    patches = x.astype(compute_dtype)
    patches = patches.reshape(B, C, gh, P, gw, P).transpose(0, 2, 4, 1, 3, 5)
    patches = patches.reshape(B, n_patches, K)
    if NP_pad != n_patches or K_pad != K:
        patches = jnp.pad(patches, ((0, 0), (0, NP_pad - n_patches), (0, K_pad - K)))
    patches = patches.reshape(rows, K_pad)    # flatten (B, NP_pad) -> one row axis

    # Conv weight stays hidden-major: no transposed (K, hidden) copy in HBM.
    w = conv_w.reshape(hidden, K).astype(compute_dtype)
    if K_pad != K or H_pad != hidden:
        w = jnp.pad(w, ((0, H_pad - hidden), (0, K_pad - K)))

    # Fold the conv bias into the position embeddings (f32 add in-kernel),
    # pad, then pre-tile to tm rows so its block index is constant.
    pos_b = (pos_emb.reshape(n_patches, hidden).astype(jnp.float32)
             + conv_b.reshape(1, hidden).astype(jnp.float32))
    if NP_pad != n_patches or H_pad != hidden:
        pos_b = jnp.pad(pos_b, ((0, NP_pad - n_patches), (0, H_pad - hidden)))
    pos_b = jnp.tile(pos_b, (ipb, 1))         # (tm, H_pad), tiny (<~2 MiB for ViT-B)

    grid = (n_blocks,)

    out = pl.pallas_call(
        _embed_kernel,
        out_shape=jax.ShapeDtypeStruct((rows, H_pad), out_dtype),
        grid_spec=pltpu.PrefetchScalarGridSpec(
            num_scalar_prefetch=0,
            grid=grid,
            in_specs=[
                # patches: the only streamed input -- tm rows, full (padded) K.
                # NOTE: if xprof shows exposed DMA on v5e, add
                #       pipeline_mode=pl.Buffered(3) here.
                pl.BlockSpec((tm, K_pad), lambda i: (i, 0)),
                # weight: whole array, constant index -> fetched once, resident.
                pl.BlockSpec((H_pad, K_pad), lambda i: (0, 0)),
                # pos+bias: pre-tiled to tm rows, constant index -> fetched once.
                pl.BlockSpec((tm, H_pad), lambda i: (0, 0)),
            ],
            out_specs=pl.BlockSpec((tm, H_pad), lambda i: (i, 0)),
        ),
        compiler_params=pltpu.CompilerParams(
            dimension_semantics=("parallel",),
            vmem_limit_bytes=_vmem_limit_bytes(tm, K_pad, H_pad,
                                               compute_dtype, out_dtype),
            # let XLA fuse the patch-extraction transpose / pad / cast into the
            # pallas-call input instead of materializing `patches` in HBM.
            allow_input_fusion=[True, False, False],
        ),
    )(patches, w, pos_b)

    # strip padding (no-op when shapes were already aligned)
    embeddings = out.reshape(B, NP_pad, H_pad)[:, :n_patches, :hidden]
    return embeddings, None   # (embeddings, features) -- features=None, non-hybrid


if __name__ == "__main__":
    # Small config consistent with the module:
    #   img_size=16, patch_size=4 -> n_patches = (16//4)*(16//4) = 16
    #   in_channels=4, hidden_size=32, batch=2
    B, C, IMG, P, HID = 2, 4, 16, 4, 32
    n_patches = (IMG // P) * (IMG // P)

    key = jax.random.PRNGKey(0)
    k_x, k_w, k_b, k_pos = jax.random.split(key, 4)

    x = jax.random.normal(k_x, (B, C, IMG, IMG), dtype=jnp.float32)
    conv_w = jax.random.normal(k_w, (HID, C, P, P), dtype=jnp.float32) * 0.02
    conv_b = jax.random.normal(k_b, (HID,), dtype=jnp.float32) * 0.02
    # nn.Parameter(torch.zeros(...)) in __init__; use small nonzero values here
    # so the position-embedding add is actually exercised.
    pos_emb = jax.random.normal(k_pos, (1, n_patches, HID), dtype=jnp.float32) * 0.02

    # pure-JAX reference: strided conv + bias + position embeddings
    ref = jax.lax.conv_general_dilated(
        x, conv_w, window_strides=(P, P), padding="VALID",
        dimension_numbers=("NCHW", "OIHW", "NCHW"))
    ref = ref + conv_b.reshape(1, HID, 1, 1)
    ref = ref.reshape(B, HID, n_patches).transpose(0, 2, 1) + pos_emb

    # Default path: bf16 matmul operands, f32 accumulation + f32 pos/bias add.
    out, feats = embeddings_forward(x, conv_w, conv_b, pos_emb, P)
    out = jax.block_until_ready(out)
    assert feats is None
    assert out.shape == (B, n_patches, HID)
    assert jnp.allclose(out, ref, atol=3e-2, rtol=3e-2)

    # Exact-f32 path.
    out_f32, _ = embeddings_forward(x, conv_w, conv_b, pos_emb, P,
                                    compute_dtype=jnp.float32)
    out_f32 = jax.block_until_ready(out_f32)
    assert jnp.allclose(out_f32, ref, atol=1e-4, rtol=1e-4)

    print("KERNEL_OK")
</pallas_src>

<mosaic_0001>
module attributes {stable_mosaic.version = 11 : i64} {
  func.func @_embed_kernel(%arg0: i32, %arg1: memref<16x128xbf16, #tpu.memory_space<vmem>>, %arg2: memref<128x128xbf16, #tpu.memory_space<vmem>>, %arg3: memref<16x128xf32, #tpu.memory_space<vmem>>, %arg4: memref<16x128xf32, #tpu.memory_space<vmem>>) attributes {dimension_semantics = [#tpu.dimension_semantics<parallel>], iteration_bounds = array<i64: 2>, scalar_prefetch = 0 : i64, scratch_operands = 0 : i64, tpu.core_type = #tpu.core_type<tc>, window_params = [{transform_indices = @transform_0, window_bounds = array<i64: 16, 128>}, {pipeline_mode = #tpu.pipeline_mode<synchronous>, transform_indices = @transform_1, window_bounds = array<i64: 128, 128>}, {pipeline_mode = #tpu.pipeline_mode<synchronous>, transform_indices = @transform_2, window_bounds = array<i64: 16, 128>}, {transform_indices = @transform_3, window_bounds = array<i64: 16, 128>}]} {
    %c0 = arith.constant 0 : index
    %c0_0 = arith.constant 0 : index
    %0 = vector.load %arg1[%c0, %c0_0] : memref<16x128xbf16, #tpu.memory_space<vmem>>, vector<16x128xbf16>
    %c0_1 = arith.constant 0 : index
    %c0_2 = arith.constant 0 : index
    %1 = vector.load %arg2[%c0_1, %c0_2] : memref<128x128xbf16, #tpu.memory_space<vmem>>, vector<128x128xbf16>
    %cst = arith.constant dense<0.000000e+00> : vector<16x128xf32>
    %2 = tpu.matmul %0, %1, %cst {dimension_numbers = #tpu.dot_dimension_numbers<[1], [1], [0], [0], [0, 0, 1, 0], [], []>} : vector<16x128xbf16>, vector<128x128xbf16>, vector<16x128xf32> -> vector<16x128xf32>
    %c0_3 = arith.constant 0 : index
    %c0_4 = arith.constant 0 : index
    %3 = vector.load %arg3[%c0_3, %c0_4] : memref<16x128xf32, #tpu.memory_space<vmem>>, vector<16x128xf32>
    %4 = arith.addf %2, %3 : vector<16x128xf32>
    %c0_5 = arith.constant 0 : index
    %c0_6 = arith.constant 0 : index
    %5 = vector.load %arg4[%c0_5, %c0_6] : memref<16x128xf32, #tpu.memory_space<vmem>>, vector<16x128xf32>
    tpu.vector_store %arg4[%c0_5, %c0_6], %4 {strides = array<i32>} : memref<16x128xf32, #tpu.memory_space<vmem>>, vector<16x128xf32>,
    return
  }
  func.func @transform_0(%arg0: i32) -> (i32, i32) {
    %c0_i32 = arith.constant 0 : i32
    %c0_i32_0 = arith.constant 0 : i32
    return %arg0, %c0_i32 : i32, i32
  }
  func.func @transform_1(%arg0: i32) -> (i32, i32) {
    %c0_i32 = arith.constant 0 : i32
    %c0_i32_0 = arith.constant 0 : i32
    %c0_i32_1 = arith.constant 0 : i32
    return %c0_i32, %c0_i32_0 : i32, i32
  }
  func.func @transform_2(%arg0: i32) -> (i32, i32) {
    %c0_i32 = arith.constant 0 : i32
    %c0_i32_0 = arith.constant 0 : i32
    %c0_i32_1 = arith.constant 0 : i32
    return %c0_i32, %c0_i32_0 : i32, i32
  }
  func.func @transform_3(%arg0: i32) -> (i32, i32) {
    %c0_i32 = arith.constant 0 : i32
    %c0_i32_0 = arith.constant 0 : i32
    return %arg0, %c0_i32 : i32, i32
  }
}

</mosaic_0001>

<bundles_post_ra>
// kernel: tpu_custom_call.1
= control target key start
LH: loop header
LB: loop body
LE: loop exit
PB: predicated region body
PF: predicated region fallthrough
CT: control target
= control target key end

     0   :  { %8 = vsyncpa [#allocation3], 0  ;;  %s1020_s0 = inlined_call_operand.hbm [shape: bf16[32,128], index: 0, kind: input, shape index: {}]   ;;  %s1021_s1 = inlined_call_operand.hbm [shape: bf16[128,128], index: 1, kind: input, shape index: {}]   ;;  %s1022_s2 = inlined_call_operand.hbm [shape: f32[16,128], index: 2, kind: input, shape index: {}]   ;;  %s1023_s3 = inlined_call_operand.hbm [shape: f32[32,128], index: 3, kind: output, shape index: {}]  }
   0x1   :  { %10 = vsyncpa [#allocation3 + $0x1], 0 }
   0x2   :  { %11 = vsyncpa [#allocation6], 0 }
   0x3   :  { %12 = vsyncpa [#allocation4], 0 }
   0x4   :  { %14 = vsyncpa [#allocation4 + $0x1], 0  ;;  %s776_s12 = smov 0   ;;  %s778_s13 = smov 0  }
   0x5   :  { %s780_s14 = smov 0   ;;  %s782_s15 = smov 0  }
   0x6 LB: > { %s797_s16 = sadd.s32 4294967295, %s742_s15   ;;  %s444_s17 = sadd.s32 4294967294, %s742_s15   ;;  %s742_s15 = sphi %s782_s15, %s1043_s15   ;;  %s738_s14 = sphi %s780_s14, %s1042_s14   ;;  %s734_s13 = sphi %s778_s13, %s1041_s13   ;;  %s730_s12 = sphi %s776_s12, %s1040_s12  }
   0x7   : > { %p40_p0 = scmp.ne.s32.totalorder %s734_s13, %s730_s12  ;;  %p1024_p1 = scmp.eq.s32.totalorder %s797_s16, 0 }
   0x8   : > { %p112_p3 = scmp.eq.s32.totalorder %s444_s17, 1  ;;  %p445_p5 = scmp.ge.s32.totalorder %s742_s15, 1 }
   0x9   : > { %p806_p4 = por %p1024_p1, %p40_p0  ;;  %p119_p7 = scmp.lt.s32.totalorder %s742_s15, 3 }
   0xa   : > { %p811_p6 = por %p112_p3, %p40_p0  ;;  %s744_s21 = smov [#allocation5]  }
   0xb   : > { %s1027_s18 = scalar_select %p806_p4, 1, 0 }
   0xc   : > { %s1028_s19 = scalar_select %p811_p6, 1, 0 }
   0xd   : > { %p816_p8 = pnand %p445_p5, %p119_p7  ;;  %s131_s22 = sshll.u32 %s744_s21, 4  ;;  %s820_s22 = int_to_ptr.vmem [resolvable:$true] %s131_s22 }
   0xe   : > { %s745_s24 = smov [#allocation7]   ;;  %s586_s28 = scalar_lea.hbm %s1021_s1, 1024 }
   0xf   : > { %p514_p9 = pneg %p816_p8  ;;  %s144_s25 = sshll.u32 %s745_s24, 4  ;;  %s831_s25 = int_to_ptr.vmem [resolvable:$true] %s144_s25 }
  0x10   : > { %p587_p12 = scmp.ne.s32.totalorder %s1021_s1, %s586_s28  ;;  %p593_p5 = scmp.lt.u32.totalorder %s586_s28, %s1021_s1 }
  0x11   : > { %p827_p11 = pnand %p514_p9, %p1024_p1 }
  0x13   : > { %p588_p13 = pneg %p827_p11 }
  0x15   : > { %p589_p0 = pnand %p588_p13, %p587_p12 }
  0x17   : > { %p590_p3 = pneg %p589_p0 }
  0x19   : > { %p595_p7 = pnand %p593_p5, %p590_p3 }
  0x1b   : > { %598 = shalt.err (!%p595_p7)
}
  0x1c   : > { %s599_s6 = scalar_lea.vmem %s820_s22, 1024  ;;  %p607_p2 = scmp.lt.s32.totalorder %s820_s22, %s820_s22 }
  0x1d   : > { %p600_p9 = scmp.ne.s32.totalorder %s820_s22, %s599_s6  ;;  %p608_p12 = scmp.lt.s32.totalorder %s599_s6, %s599_s6 }
  0x1f   : > { %p602_p10 = pnand %p600_p9, %p588_p13  ;;  %p609_p0 = por %p608_p12, %p607_p2 }
  0x21   : > { %p603_p1 = pneg %p602_p10 }
  0x23   : > { %p610_p6 = pnand %p609_p0, %p603_p1 }
  0x25   : > { %613 = shalt.err (!%p610_p6)
}
  0x26   : > { %s746_s7 = smov 64   ;;  %s747_s8 = smov 4  }
  0x27   : > { %517 = dma.hbm_to_vmem [thread:$0]  (!%p827_p11), %s1021_s1, 1024, %s820_s22, [#allocation6], %s746_s7, %s746_s7, %s747_s8  }
  0x28   : > { %s614_s21 = scalar_lea.hbm %s1022_s2, 256 }
  0x29   : > { %p615_p1 = scmp.ne.s32.totalorder %s1022_s2, %s614_s21  ;;  %p621_p10 = scmp.lt.u32.totalorder %s614_s21, %s1022_s2 }
  0x2b   : > { %p617_p2 = pnand %p615_p1, %p588_p13 }
  0x2d   : > { %p618_p6 = pneg %p617_p2 }
  0x2f   : > { %p623_p3 = pnand %p621_p10, %p618_p6 }
  0x31   : > { %626 = shalt.err (!%p623_p3)
}
  0x32   : > { %s627_s22 = scalar_lea.vmem %s831_s25, 256  ;;  %p635_p12 = scmp.lt.s32.totalorder %s831_s25, %s831_s25 }
  0x33   : > { %p628_p5 = scmp.ne.s32.totalorder %s831_s25, %s627_s22  ;;  %p636_p0 = scmp.lt.s32.totalorder %s627_s22, %s627_s22 }
  0x35   : > { %p630_p7 = pnand %p628_p5, %p588_p13  ;;  %p637_p1 = por %p636_p0, %p635_p12 }
  0x37   : > { %p631_p9 = pneg %p630_p7 }
  0x39   : > { %p638_p2 = pnand %p637_p1, %p631_p9 }
  0x3b   : > { %641 = shalt.err (!%p638_p2)
}
  0x3c   : > { %s748_s29 = smov 128   ;;  %s749_s30 = smov 8  }
  0x3d   : > { %520 = dma.hbm_to_vmem [thread:$0]  (!%p827_p11), %s1022_s2, 256, %s831_s25, [#allocation6], %s748_s29, %s748_s29, %s749_s30  }
  0x3e   : > { %s889_s6 = sadd.s32 1, %s742_s15   ;;  %s27_s10 = sadd.s32 1, %s738_s14 }
  0x3f   : > { %s24_s9 = ssub.s32 %s742_s15, %s889_s6  ;;  %p34_p6 = scmp.ne.s32.totalorder %s738_s14, %s734_s13 }
  0x40   : > { %p25_p13 = scmp.eq.s32.totalorder %s24_s9, 0  ;;  %p35_p10 = scmp.eq.s32.totalorder %s742_s15, 0 }
  0x41   : > { %p1031_p5 = scmp.eq.s32.totalorder %s797_s16, 1  ;;  %p531_p9 = scmp.lt.s32.totalorder %s742_s15, 2 }
  0x42   : > { %s898_s11 = scalar_select %p25_p13, %s738_s14, %s27_s10  }
  0x43   : > { %p36_p3 = por %p35_p10, %p34_p6  ;;  %p902_p7 = por %p1031_p5, %p34_p6 }
  0x44   : > { %s158_s23 = sand.u32 1, %s738_s14   ;;  %s471_s25 = sshll.u32 %s742_s15, 7 }
  0x45   : > { %s1032_s17 = scalar_select %p902_p7, 1, 0 }
  0x46   : > { %s449_s21 = sshll.u32 %s158_s23, 3  ;;  %s912_s27 = scalar_lea.hbm %s1020_s0, %s471_s25 }
  0x47   : > { %s162_s28 = scalar_lea.vmem [#allocation2], %s449_s21  ;;  %p916_p11 = pnand %p531_p9, %p36_p3 }
  0x48   : > { %s169_s22 = sshll.u32 %s162_s28, 4  ;;  %s920_s30 = scalar_lea.sflag [#allocation3], %s158_s23  ;;  %s914_s22 = int_to_ptr.vmem [resolvable:$true] %s169_s22 }
  0x49   : > { %s642_s4 = scalar_lea.hbm %s912_s27, 128  ;;  %p644_p0 = pneg %p916_p11 }
  0x4a   : > { %p643_p12 = scmp.ne.s32.totalorder %s912_s27, %s642_s4  ;;  %s647_s10 = scalar_lea.hbm %s1020_s0, 256 }
  0x4b   : > { %p648_p13 = scmp.lt.u32.totalorder %s912_s27, %s1020_s0  ;;  %p649_p6 = scmp.lt.u32.totalorder %s647_s10, %s642_s4 }
  0x4c   : > { %p645_p1 = pnand %p644_p0, %p643_p12  ;;  %p651_p3 = scmp.lt.u32.totalorder %s642_s4, %s912_s27 }
  0x4d   : > { %p650_p10 = por %p649_p6, %p648_p13 }
  0x4e   : > { %p646_p2 = pneg %p645_p1 }
  0x4f   : > { %p652_p5 = por %p651_p3, %p650_p10 }
  0x51   : > { %p653_p9 = pnand %p652_p5, %p646_p2 }
  0x53   : > { %656 = shalt.err (!%p653_p9)
}
  0x54   : > { %s657_s23 = scalar_lea.vmem %s914_s22, 128  ;;  %s750_s24 = smov [#allocation2]  }
  0x55   : > { %p658_p12 = scmp.ne.s32.totalorder %s914_s22, %s657_s23  ;;  %s662_s26 = sshll.u32 %s750_s24, 4  ;;  %s663_s26 = int_to_ptr.vmem [resolvable:$false] %s662_s26 }
  0x56   : > { %s664_s28 = scalar_lea.vmem %s663_s26, 256  ;;  %p665_p4 = scmp.lt.s32.totalorder %s914_s22, %s663_s26 }
  0x57   : > { %p660_p1 = pnand %p658_p12, %p644_p0  ;;  %p666_p13 = scmp.lt.s32.totalorder %s664_s28, %s657_s23 }
  0x59   : > { %p661_p7 = pneg %p660_p1  ;;  %p667_p6 = por %p666_p13, %p665_p4 }
  0x5b   : > { %p668_p10 = pnand %p667_p6, %p661_p7 }
  0x5d   : > { %671 = shalt.err (!%p668_p10)
}
  0x5e   : > { %524 = dma.hbm_to_vmem [thread:$0]  (!%p916_p11), %s912_s27, 128, %s914_s22, %s920_s30, %s746_s7, %s746_s7, %s747_s8  }
  0x5f   : > { %181 = sbr.rel (%p816_p8) target bundleno = 402 (0x192), region = 32  ;;  %s954_s4 = sand.u32 (!%p816_p8), 1, %s734_s13  }
  0x60   : > { %s453_s5 = sshll.u32 (!%p816_p8), %s954_s4, 3  ;;  %s184_s9 = scalar_lea.sflag (!%p816_p8), [#allocation3], %s954_s4 }
  0x61   : > { %s958_s10 = scalar_lea.vmem (!%p816_p8), [#allocation2], %s453_s5  ;;  %p1034_p4 = scmp.ne.s32.totalorder (!%p816_p8), %s1027_s18, 0 }
  0x66   : > { %717 = dma.done.wait (%p1034_p4), %s184_s9, 128  }
  0x67   : > { %719 = vsyncadd (%p1034_p4), %s184_s9, 4294967168  ;;  %p1035_p7 = scmp.eq.s32.totalorder %s797_s16, 0 }
  0x69   : > { %721 = dma.done.wait (%p1035_p7), [#allocation6], 1280   ;;  %p1036_p8 = pmov %p1035_p7 }
  0x6a   : > { %v751_v0 = vmov 0.0   ;;  %vm752_vm0 = vmmov 0   ;;  %v577_v1 = vld [vmem:[#allocation5] sm:$0xff]   ;;  %v578_v2 = vld [vmem:[#allocation5 + $0x8] sm:$0xff]   ;;  %v579_v3 = vld [vmem:[#allocation5 + $0x10] sm:$0xff]   ;;  %s456_s18 = sshll.u32 %s954_s4, 4 }
  0x6b   : > { %723 = vsyncadd (%p1036_p8), [#allocation6], 4294966016  ;;  %482 = vmatprep.subr.bf16.mxu0 %v751_v0  ;;  %498 = vmatprep.mubr.msk.bf16.mxu0 %vm752_vm0, %v751_v0  ;;  %v580_v4 = vld [vmem:[#allocation5 + $0x18] sm:$0xff]   ;;  %v581_v5 = vld [vmem:[#allocation5 + $0x20] sm:$0xff]   ;;  %s217_s20 = scalar_lea.vmem [#allocation8], %s456_s18  ;;  %s472_s8 = sshll.u32 %s797_s16, 8 }
  0x6c   : > { %483 = vmatpush3.bf16.xpose.msra.mxu0 %v577_v1  ;;  %v582_v6 = vld [vmem:[#allocation5 + $0x28] sm:$0xff]   ;;  %v583_v7 = vld [vmem:[#allocation5 + $0x30] sm:$0xff]   ;;  %v584_v8 = vld [vmem:[#allocation5 + $0x38] sm:$0xff]   ;;  %s352_s7 = sshll.u32 %s217_s20, 4  ;;  %s976_s29 = scalar_lea.hbm %s1023_s3, %s472_s8  ;;  %s971_s7 = int_to_ptr.vmem [resolvable:$true] %s352_s7 }
  0x6d   : > { %484 = vmatprep.subr.bf16.mxu0 %v751_v0  ;;  %v585_v9 = vld [vmem:[%s958_s10] sm:$0xff]   ;;  %v239_v10 = vld [vmem:[#allocation7] sm:$0xff]  ;;  %v240_v12 = vld [vmem:[#allocation7 + $0x8] sm:$0xff]  ;;  %s339_s16 = scalar_lea.sflag [#allocation4], %s954_s4  ;;  %s672_s30 = scalar_lea.vmem %s971_s7, 256 }
  0x6e   : > { %p673_p11 = scmp.ne.s32.totalorder %s971_s7, %s672_s30  ;;  %p1037_p0 = scmp.ne.s32.totalorder %s1032_s17, 0 }
  0x6f   : > { %s753_s21 = smov [#allocation8]  }
  0x70   : > { %p674_p2 = pnand %p673_p11, %p1037_p0  ;;  %s676_s25 = sshll.u32 %s753_s21, 4  ;;  %s677_s25 = int_to_ptr.vmem [resolvable:$false] %s676_s25 }
  0x71   : > { %s678_s23 = scalar_lea.vmem %s677_s25, 512  ;;  %p679_p5 = scmp.lt.s32.totalorder %s971_s7, %s677_s25 }
  0x72   : > { %p675_p3 = pneg %p674_p2  ;;  %p680_p9 = scmp.lt.s32.totalorder %s678_s23, %s672_s30 }
  0x74   : > { %485 = vmatpush3.bf16.xpose.msra.mxu0 %v578_v2  ;;  %p681_p12 = por %p680_p9, %p679_p5 }
  0x75   : > { %486 = vmatprep.subr.bf16.mxu0 %v751_v0 }
  0x76   : > { %p682_p1 = pnand %p681_p12, %p675_p3 }
  0x7c   : > { %487 = vmatpush3.bf16.xpose.msra.mxu0 %v579_v3 }
  0x7d   : > { %488 = vmatprep.subr.bf16.mxu0 %v751_v0 }
  0x84   : > { %489 = vmatpush3.bf16.xpose.msra.mxu0 %v580_v4 }
  0x85   : > { %490 = vmatprep.subr.bf16.mxu0 %v751_v0 }
  0x8c   : > { %491 = vmatpush3.bf16.xpose.msra.mxu0 %v581_v5 }
  0x8d   : > { %492 = vmatprep.subr.bf16.mxu0 %v751_v0 }
  0x94   : > { %493 = vmatpush3.bf16.xpose.msra.mxu0 %v582_v6 }
  0x95   : > { %494 = vmatprep.subr.bf16.mxu0 %v751_v0 }
  0x9c   : > { %495 = vmatpush3.bf16.xpose.msra.mxu0 %v583_v7 }
  0x9d   : > { %496 = vmatprep.subr.bf16.mxu0 %v751_v0 }
  0xa4   : > { %497 = vmatpush3.bf16.xpose.msra.mxu0 %v584_v8 }
  0xab   : > { %499 = vmatmul.mubr.bf16.vlgmr.msra.gmra.mrb[0].mxu0 %v585_v9 }
 0x17e   : > { %v329_v11 = vpop.f32.mrb[0].mxu0 }
 0x17f   : > { %v330_v13 = vadd.f32 %v329_v11, %v239_v10  ;;  %v500_v14 = vpop.f32.mrb[1].mxu0 }
 0x180   : > { %v332_v15 = vpop.f32.mrb[2].mxu0 }
 0x181   : > { %336 = vst [vmem:[%s217_s20] sm:$0xff] %v330_v13  ;;  %v333_v16 = vadd.f32 %v332_v15, %v240_v12  ;;  %v501_v17 = vpop.f32.mrb[3].mxu0 }
 0x183   : > { %337 = vst [vmem:[%s217_s20 + $0x8] sm:$0xff] %v333_v16 }
 0x184   : > { %685 = shalt.err (!%p682_p1)
}
 0x185   : > { %s686_s24 = scalar_lea.hbm %s976_s29, 256  ;;  %s690_s5 = scalar_lea.hbm %s1023_s3, 512 }
 0x186   : > { %p687_p13 = scmp.ne.s32.totalorder %s976_s29, %s686_s24  ;;  %p691_p4 = scmp.lt.u32.totalorder %s976_s29, %s1023_s3 }
 0x187   : > { %p692_p7 = scmp.lt.u32.totalorder %s690_s5, %s686_s24  ;;  %p694_p11 = scmp.lt.u32.totalorder %s686_s24, %s976_s29 }
 0x188   : > { %p688_p6 = pnand %p687_p13, %p1037_p0 }
 0x189   : > { %p693_p8 = por %p692_p7, %p691_p4 }
 0x18a   : > { %p689_p10 = pneg %p688_p6 }
 0x18b   : > { %p695_p2 = por %p694_p11, %p693_p8 }
 0x18d   : > { %p696_p3 = pnand %p695_p2, %p689_p10 }
 0x18f   : > { %699 = shalt.err (!%p696_p3)
}
 0x190   : > { %s754_s18 = smov 128   ;;  %s755_s20 = smov 8  }
 0x191   : > { %512 = dma.vmem_to_hbm [thread:$0]  (%p1037_p0), %s971_s7, 256, %s976_s29, %s339_s16, %s754_s18, %s754_s18, %s755_s20  }
 0x192 PF: > { %s367_s8 = sand.u32 1, %s730_s12   ;;  %p1038_p5 = scmp.ne.s32.totalorder %s1028_s19, 0 }
 0x193   : > { %p1039_p9 = scmp.ge.s32.totalorder %s742_s15, 2  ;;  %s368_s27 = scalar_lea.sflag [#allocation4], %s367_s8 }
 0x195   : > { %p526_p12 = pnand %p1039_p9, %p1038_p5 }
 0x197   : > { %725 = dma.done.wait (!%p526_p12), %s368_s27, 256  }
 0x198   : > { %727 = vsyncadd (!%p526_p12), %s368_s27, 4294967040  ;;  %p17_p1 = scmp.ge.s32.totalorder %s889_s6, 4   ;;  %s1040_s12 = smov %s734_s13 }
 0x199   : > { %s1041_s13 = smov %s738_s14  ;;  %s1042_s14 = smov %s898_s11 }
 0x19a   : > { %s1043_s15 = smov %s889_s6  ;;  %19 = sbr.rel (!%p17_p1) target bundleno = 6 (0x6), region = 85 }
 0x1a1   :  { %373 = vsyncpa [#allocation3], 1 }
 0x1a2   :  { %375 = vsyncpa [#allocation3 + $0x1], 1 }
 0x1a3   :  { %376 = vsyncpa [#allocation6], 1 }
 0x1a4   :  { %377 = vsyncpa [#allocation4], 1 }
 0x1a5   :  { %379 = vsyncpa [#allocation4 + $0x1], 1 }

</bundles_post_ra>
